<compile_context>
chip_gen: v7x
topology: tpu7x:2x2x1
jax: 0.10.0
libtpu: 0.0.40
codegen_flags: <defaults>
</compile_context>

<pallas_src>
import jax
import jax.numpy as jnp
from jax.experimental import pallas as pl
from jax.experimental.pallas import tpu as pltpu

# Small shapes consistent with the module.
BATCH = 2
SEQ = 8
D_MODEL = 32
VOCAB = 128
PAD_IDX = 0

TOKEN_TILE = 128  # tokens per grid step (lane-dense output; raise to 256-512 at scale)


def role_sensitive_embedding_kernel(ids_ref, role_ref, table_t_ref, w_ref, out_ref):
    ids = ids_ref[...]          # (1, T) int32, lane-major token ids
    roles = role_ref[...]       # (1, T) int32, lane-major role mask
    table_t = table_t_ref[...]  # (D, V) bf16, transposed embedding table
    w_all = w_ref[...]          # (2D, D) bf16 = [W0 ; W1] stacked on rows

    d, v = table_t.shape
    t = ids.shape[1]

    # Embedding gather as a one-hot matmul with tokens on the 128-lane axis.
    # (1, T) -> (V, T) is a cheap sublane broadcast; compare is VPU.
    row = jax.lax.broadcasted_iota(jnp.int32, (v, t), 0)
    onehot = (row == ids).astype(jnp.bfloat16)                            # (V, T)
    x_t = jnp.dot(table_t, onehot, preferred_element_type=jnp.float32)    # (D, T) f32

    # Both role transforms in one MXU call. x_t values are exact copies of
    # bf16 table rows, so the re-cast to bf16 is lossless.
    y_t = jnp.dot(w_all, x_t.astype(jnp.bfloat16),
                  preferred_element_type=jnp.float32)                     # (2D, T) f32
    y0 = y_t[:d, :]
    y1 = y_t[d:, :]

    # Per-token role select in f32. Roles outside {0, 1} (including the
    # wrapper's padding tokens) produce zeros, matching torch.zeros_like.
    out_ref[...] = jnp.where(roles == 0, y0,
                             jnp.where(roles == 1, y1, jnp.zeros_like(y1)))


def role_sensitive_embedding(input_ids, role_mask, table_t_bf16, w_all_bf16):
    """input_ids: (B, L) int, role_mask: (B, L) int,
    table_t_bf16: (D, V) bf16 (transposed embedding table, padding row zero),
    w_all_bf16: (2D, D) bf16 = [W0; W1].  Returns (B, L, D) float32."""
    B, L = input_ids.shape
    D, V = table_t_bf16.shape
    N = B * L
    n_pad = pl.cdiv(N, TOKEN_TILE) * TOKEN_TILE

    # Lane-major (1, N_pad) int32; pad ids with PAD_IDX and roles with an
    # invalid role (2) so padded lanes come out zero and are sliced off.
    ids = jnp.full((1, n_pad), PAD_IDX, jnp.int32)
    ids = ids.at[0, :N].set(input_ids.reshape(-1).astype(jnp.int32))
    roles = jnp.full((1, n_pad), 2, jnp.int32)
    roles = roles.at[0, :N].set(role_mask.reshape(-1).astype(jnp.int32))

    out_t = pl.pallas_call(
        role_sensitive_embedding_kernel,
        out_shape=jax.ShapeDtypeStruct((D, n_pad), jnp.float32),
        grid_spec=pltpu.PrefetchScalarGridSpec(
            num_scalar_prefetch=0,
            grid=(n_pad // TOKEN_TILE,),
            in_specs=[
                pl.BlockSpec((1, TOKEN_TILE), lambda i: (0, i)),   # ids (lane-major)
                pl.BlockSpec((1, TOKEN_TILE), lambda i: (0, i)),   # roles (lane-major)
                pl.BlockSpec((D, V), lambda i: (0, 0)),            # table^T, resident
                pl.BlockSpec((2 * D, D), lambda i: (0, 0)),        # [W0; W1], resident
            ],
            out_specs=pl.BlockSpec((D, TOKEN_TILE), lambda i: (0, i)),
        ),
        compiler_params=pltpu.CompilerParams(dimension_semantics=("parallel",)),
    )(ids, roles, table_t_bf16, w_all_bf16)

    # Layout plumbing only: (D, N_pad) -> (B, L, D).
    return out_t[:, :N].T.reshape(B, L, D)


# ------------------------- parameter init (deterministic) -------------------
def init_params(key):
    kt, k0, k1 = jax.random.split(key, 3)

    def bf16_exact(a):
        # Round to bf16-representable values so the bf16 MXU operands in the
        # kernel and the f32 reference see identical values.
        return a.astype(jnp.bfloat16).astype(jnp.float32)

    table = bf16_exact(jax.random.normal(kt, (VOCAB, D_MODEL), jnp.float32))
    table = table.at[PAD_IDX].set(0.0)    # nn.Embedding zeroes the padding row

    eye = jnp.eye(D_MODEL, dtype=jnp.float32)
    # The module initializes both role transformers to identity; perturb them
    # slightly so the role-selection path is actually exercised by the check.
    w0 = bf16_exact(eye + 0.02 * jax.random.normal(k0, (D_MODEL, D_MODEL), jnp.float32))
    w1 = bf16_exact(eye + 0.02 * jax.random.normal(k1, (D_MODEL, D_MODEL), jnp.float32))

    # One-time host transform: transposed bf16 table (D, V) and stacked bf16
    # weights (2D, D) = [W0; W1] (nn.Linear: y = W @ x in the transposed layout).
    table_t_bf16 = table.T.astype(jnp.bfloat16)
    w_all_bf16 = jnp.concatenate([w0, w1], axis=0).astype(jnp.bfloat16)
    return dict(table=table, w0=w0, w1=w1,
                table_t=table_t_bf16, w_all=w_all_bf16)


# ------------------------- pure-JAX reference for checking ------------------
def reference(input_ids, role_mask, table, w0, w1):
    x = table[input_ids]                       # (B, L, D) embedding lookup
    y0 = x @ w0.T
    y1 = x @ w1.T
    m = role_mask[..., None]
    return jnp.where(m == 0, y0, jnp.where(m == 1, y1, jnp.zeros_like(y1)))


if __name__ == "__main__":
    key = jax.random.PRNGKey(0)
    ki, km, kp = jax.random.split(key, 3)

    input_ids = jax.random.randint(ki, (BATCH, SEQ), 0, VOCAB, jnp.int32)
    input_ids = input_ids.at[0, 0].set(PAD_IDX)          # exercise padding row
    role_mask = jax.random.bernoulli(km, 0.5, (BATCH, SEQ)).astype(jnp.int32)
    params = init_params(kp)

    out = role_sensitive_embedding(input_ids, role_mask,
                                   params["table_t"], params["w_all"])
    out = jax.block_until_ready(out)

    ref = reference(input_ids, role_mask, params["table"], params["w0"], params["w1"])
    assert out.shape == (BATCH, SEQ, D_MODEL)
    err = jnp.max(jnp.abs(out - ref))
    assert jnp.allclose(out, ref, rtol=1e-4, atol=1e-4), f"max abs err = {err}"

    print("KERNEL_OK")
</pallas_src>

<mosaic_0001>
module attributes {stable_mosaic.version = 11 : i64} {
  func.func @role_sensitive_embedding_kernel(%arg0: i32, %arg1: memref<1x128xi32, #tpu.memory_space<vmem>>, %arg2: memref<1x128xi32, #tpu.memory_space<vmem>>, %arg3: memref<32x128xbf16, #tpu.memory_space<vmem>>, %arg4: memref<64x32xbf16, #tpu.memory_space<vmem>>, %arg5: memref<32x128xf32, #tpu.memory_space<vmem>>) attributes {dimension_semantics = [#tpu.dimension_semantics<parallel>], iteration_bounds = array<i64: 1>, scalar_prefetch = 0 : i64, scratch_operands = 0 : i64, tpu.core_type = #tpu.core_type<tc>, window_params = [{transform_indices = @transform_0, window_bounds = array<i64: 1, 128>}, {transform_indices = @transform_1, window_bounds = array<i64: 1, 128>}, {pipeline_mode = #tpu.pipeline_mode<synchronous>, transform_indices = @transform_2, window_bounds = array<i64: 32, 128>}, {pipeline_mode = #tpu.pipeline_mode<synchronous>, transform_indices = @transform_3, window_bounds = array<i64: 64, 32>}, {transform_indices = @transform_4, window_bounds = array<i64: 32, 128>}]} {
    %c0 = arith.constant 0 : index
    %c0_0 = arith.constant 0 : index
    %0 = vector.load %arg1[%c0, %c0_0] : memref<1x128xi32, #tpu.memory_space<vmem>>, vector<1x128xi32>
    %c0_1 = arith.constant 0 : index
    %c0_2 = arith.constant 0 : index
    %1 = vector.load %arg2[%c0_1, %c0_2] : memref<1x128xi32, #tpu.memory_space<vmem>>, vector<1x128xi32>
    %c0_3 = arith.constant 0 : index
    %c0_4 = arith.constant 0 : index
    %2 = vector.load %arg3[%c0_3, %c0_4] : memref<32x128xbf16, #tpu.memory_space<vmem>>, vector<32x128xbf16>
    %c0_5 = arith.constant 0 : index
    %c0_6 = arith.constant 0 : index
    %3 = vector.load %arg4[%c0_5, %c0_6] : memref<64x32xbf16, #tpu.memory_space<vmem>>, vector<64x32xbf16>
    %4 = tpu.iota {dimensions = array<i32: 0>} : vector<128x128xi32>
    %5 = vector.broadcast %0 : vector<1x128xi32> to vector<128x128xi32>
    %6 = arith.cmpi eq, %4, %5 : vector<128x128xi32>
    %7 = arith.extui %6 : vector<128x128xi1> to vector<128x128xi32>
    %8 = arith.sitofp %7 : vector<128x128xi32> to vector<128x128xf32>
    %9 = arith.truncf %8 : vector<128x128xf32> to vector<128x128xbf16>
    %cst = arith.constant dense<0.000000e+00> : vector<32x128xf32>
    %10 = tpu.matmul %2, %9, %cst {dimension_numbers = #tpu.dot_dimension_numbers<[1], [0], [0], [1], [0, 0, 1, 1], [], []>} : vector<32x128xbf16>, vector<128x128xbf16>, vector<32x128xf32> -> vector<32x128xf32>
    %11 = arith.truncf %10 : vector<32x128xf32> to vector<32x128xbf16>
    %cst_7 = arith.constant dense<0.000000e+00> : vector<64x128xf32>
    %12 = tpu.matmul %3, %11, %cst_7 {dimension_numbers = #tpu.dot_dimension_numbers<[1], [0], [0], [1], [0, 0, 1, 1], [], []>} : vector<64x32xbf16>, vector<32x128xbf16>, vector<64x128xf32> -> vector<64x128xf32>
    %13 = vector.extract_strided_slice %12 {offsets = [0, 0], sizes = [32, 128], strides = [1, 1]} : vector<64x128xf32> to vector<32x128xf32>
    %14 = vector.extract_strided_slice %12 {offsets = [32, 0], sizes = [32, 128], strides = [1, 1]} : vector<64x128xf32> to vector<32x128xf32>
    %c0_i32 = arith.constant 0 : i32
    %15 = vector.broadcast %c0_i32 : i32 to vector<1x128xi32>
    %16 = arith.cmpi eq, %1, %15 : vector<1x128xi32>
    %c1_i32 = arith.constant 1 : i32
    %17 = vector.broadcast %c1_i32 : i32 to vector<1x128xi32>
    %18 = arith.cmpi eq, %1, %17 : vector<1x128xi32>
    %cst_8 = arith.constant 0.000000e+00 : f32
    %19 = vector.broadcast %cst_8 : f32 to vector<32x128xf32>
    %20 = vector.shape_cast %18 : vector<1x128xi1> to vector<1x128xi1>
    %21 = vector.broadcast %20 : vector<1x128xi1> to vector<32x128xi1>
    %22 = arith.select %21, %14, %19 : vector<32x128xi1>, vector<32x128xf32>
    %23 = vector.shape_cast %16 : vector<1x128xi1> to vector<1x128xi1>
    %24 = vector.broadcast %23 : vector<1x128xi1> to vector<32x128xi1>
    %25 = arith.select %24, %13, %22 : vector<32x128xi1>, vector<32x128xf32>
    %c0_9 = arith.constant 0 : index
    %c0_10 = arith.constant 0 : index
    %26 = vector.load %arg5[%c0_9, %c0_10] : memref<32x128xf32, #tpu.memory_space<vmem>>, vector<32x128xf32>
    tpu.vector_store %arg5[%c0_9, %c0_10], %25 {strides = array<i32>} : memref<32x128xf32, #tpu.memory_space<vmem>>, vector<32x128xf32>,
    return
  }
  func.func @transform_0(%arg0: i32) -> (i32, i32) {
    %c0_i32 = arith.constant 0 : i32
    %c0_i32_0 = arith.constant 0 : i32
    return %c0_i32, %arg0 : i32, i32
  }
  func.func @transform_1(%arg0: i32) -> (i32, i32) {
    %c0_i32 = arith.constant 0 : i32
    %c0_i32_0 = arith.constant 0 : i32
    return %c0_i32, %arg0 : i32, i32
  }
  func.func @transform_2(%arg0: i32) -> (i32, i32) {
    %c0_i32 = arith.constant 0 : i32
    %c0_i32_0 = arith.constant 0 : i32
    %c0_i32_1 = arith.constant 0 : i32
    return %c0_i32, %c0_i32_0 : i32, i32
  }
  func.func @transform_3(%arg0: i32) -> (i32, i32) {
    %c0_i32 = arith.constant 0 : i32
    %c0_i32_0 = arith.constant 0 : i32
    %c0_i32_1 = arith.constant 0 : i32
    return %c0_i32, %c0_i32_0 : i32, i32
  }
  func.func @transform_4(%arg0: i32) -> (i32, i32) {
    %c0_i32 = arith.constant 0 : i32
    %c0_i32_0 = arith.constant 0 : i32
    return %c0_i32, %arg0 : i32, i32
  }
}

</mosaic_0001>

<bundles_post_ra>
// kernel: tpu_custom_call.1
= control target key start
LH: loop header
LB: loop body
LE: loop exit
PB: predicated region body
PF: predicated region fallthrough
CT: control target
= control target key end

     0   :  { %v33_v1 = vlaneseq  ;;  %v439_v11 = vmov 1.0|1.0   ;;  %s536_s0 = inlined_call_operand.vmem [shape: s32[1,128], index: 0, kind: input, shape index: {}]   ;;  %s537_s1 = inlined_call_operand.vmem [shape: s32[1,128], index: 1, kind: input, shape index: {}]   ;;  %s538_s2 = inlined_call_operand.vmem [shape: bf16[32,128], index: 2, kind: input, shape index: {}]   ;;  %s539_s3 = inlined_call_operand.vmem [shape: bf16[64,32], index: 3, kind: input, shape index: {}]   ;;  %s540_s4 = inlined_call_operand.hbm [shape: f32[32,128], index: 4, kind: output, shape index: {}]  }
   0x1   :  { %v313_v0 = vld [vmem:[%s536_s0] ss:$0 sm:$0xff] }
   0x2   :  { %v409_v2 = vld [vmem:[%s538_s2] sm:$0xff]   ;;  %v475_v3 = vshrl.u32 %v33_v1, 7 }
   0x3   :  { %388 = vmatprep.mubr.bf16.mxu0 %v409_v2 }
   0x4   :  { %v35_v4 = vadd.s32 8, %v475_v3  ;;  %vm54_vm0 = vcmp.eq.s32.totalorder %v475_v3, %v313_v0  ;;  %v36_v5 = vadd.s32 16, %v475_v3  ;;  %v37_v6 = vadd.s32 24, %v475_v3 }
   0x5   :  { %v38_v7 = vadd.s32 32, %v475_v3  ;;  %v39_v8 = vadd.s32 40, %v475_v3  ;;  %v40_v9 = vadd.s32 48, %v475_v3  ;;  %v41_v10 = vadd.s32 56, %v475_v3 }
   0x6   :  { %vm55_vm1 = vcmp.eq.s32.totalorder %v35_v4, %v313_v0  ;;  %vm56_vm2 = vcmp.eq.s32.totalorder %v36_v5, %v313_v0  ;;  %vm57_vm3 = vcmp.eq.s32.totalorder %v37_v6, %v313_v0  ;;  %v42_v12 = vadd.s32 64, %v475_v3 }
   0x7   :  { %vm332_vm4 = vmpackc.low %vm55_vm1, %vm54_vm0  ;;  %vm58_vm6 = vcmp.eq.s32.totalorder %v38_v7, %v313_v0  ;;  %vm59_vm7 = vcmp.eq.s32.totalorder %v39_v8, %v313_v0  ;;  %vm60_vm9 = vcmp.eq.s32.totalorder %v40_v9, %v313_v0  ;;  %vm61_vm10 = vcmp.eq.s32.totalorder %v41_v10, %v313_v0 }
   0x8   :  { %372 = vmatprep.subr.msk.bf16.mxu0 %vm332_vm4, %v439_v11  ;;  %vm334_vm5 = vmpackc.low %vm57_vm3, %vm56_vm2  ;;  %v43_v13 = vadd.s32 72, %v475_v3 }
   0x9   :  { %373 = vmatpush3.bf16.msk.msra.mxu0 %vm332_vm4, %v439_v11  ;;  %vm336_vm8 = vmpackc.low %vm59_vm7, %vm58_vm6 }
   0xa   :  { %374 = vmatprep.subr.msk.bf16.mxu0 %vm334_vm5, %v439_v11  ;;  %vm338_vm11 = vmpackc.low %vm61_vm10, %vm60_vm9 }
   0xd   :  { %375 = vmatpush3.bf16.msk.msra.mxu0 %vm334_vm5, %v439_v11 }
   0xe   :  { %376 = vmatprep.subr.msk.bf16.mxu0 %vm336_vm8, %v439_v11 }
   0xf   :  { %9 = vsyncpa [#allocation3], 0  ;;  %vm62_vm12 = vcmp.eq.s32.totalorder %v42_v12, %v313_v0  ;;  %vm63_vm13 = vcmp.eq.s32.totalorder %v43_v13, %v313_v0  ;;  %v44_v14 = vadd.s32 80, %v475_v3  ;;  %v45_v15 = vadd.s32 88, %v475_v3  ;;  %v410_v20 = vld [vmem:[%s538_s2 + $0x8] sm:$0xff]   ;;  %v411_v21 = vld [vmem:[%s539_s3] sm:$0xff]  }
  0x10   :  { %vm340_vm14 = vmpackc.low %vm63_vm13, %vm62_vm12  ;;  %v46_v16 = vadd.s32 96, %v475_v3  ;;  %v47_v17 = vadd.s32 104, %v475_v3  ;;  %v48_v18 = vadd.s32 112, %v475_v3  ;;  %v49_v19 = vadd.s32 120, %v475_v3  ;;  %v412_v28 = vld [vmem:[%s539_s3 + $0x8] sm:$0xff]   ;;  %v413_v29 = vld [vmem:[%s539_s3 + $0x10] sm:$0xff]  }
  0x11   :  { %377 = vmatpush3.bf16.msk.msra.mxu0 %vm336_vm8, %v439_v11  ;;  %vm64_vm15 = vcmp.eq.s32.totalorder %v44_v14, %v313_v0  ;;  %vm65_vm0 = vcmp.eq.s32.totalorder %v45_v15, %v313_v0  ;;  %vm193_vm8 = vcmask 261120   ;;  %v414_v30 = vld [vmem:[%s539_s3 + $0x18] sm:$0xff]   ;;  %v20_v31 = vld [vmem:[%s537_s1] sm:$0x1]  ;;  %v276_v32 = vsub.s32 0, %v475_v3  ;;  %s441_s3 = smov [#allocation2]  }
  0x12   :  { %378 = vmatprep.subr.msk.bf16.mxu0 %vm338_vm11, %v439_v11  ;;  %vm342_vm1 = vmpackc.low %vm65_vm0, %vm64_vm15  ;;  %vm66_vm2 = vcmp.eq.s32.totalorder %v46_v16, %v313_v0  ;;  %vm67_vm3 = vcmp.eq.s32.totalorder %v47_v17, %v313_v0  ;;  %vm68_vm5 = vcmp.eq.s32.totalorder %v48_v18, %v313_v0  ;;  %vm69_vm6 = vcmp.eq.s32.totalorder %v49_v19, %v313_v0  ;;  %s302_s29 = sshll.u32 %s441_s3, 4  ;;  %s303_s29 = int_to_ptr.vmem [resolvable:$true] %s302_s29 }
  0x13   :  { %vm344_vm4 = vmpackc.low %vm67_vm3, %vm66_vm2  ;;  %396 = vmatprep.mubr.msk.bf16.mxu1 %vm193_vm8, %v411_v21  ;;  %vm272_vm9 = vcmp.eq.s32.totalorder %v20_v31, 1  ;;  %vm271_vm10 = vcmp.eq.s32.totalorder %v20_v31, 0  ;;  %v440_v33 = vmov 0   ;;  %s415_s1 = scalar_lea.vmem %s303_s29, 512  ;;  %p420_p1 = scmp.lt.s32.totalorder %s303_s29, %s303_s29 }
  0x14   :  { %vm346_vm7 = vmpackc.low %vm69_vm6, %vm68_vm5  ;;  %v273_v34 = vsel %vm272_vm9, 1, %v440_v33  ;;  %v283_v36 = vsel %vm271_vm10, 1, %v440_v33  ;;  %p416_p0 = scmp.ne.s32.totalorder %s303_s29, %s415_s1  ;;  %p421_p2 = scmp.lt.s32.totalorder %s415_s1, %s415_s1 }
  0x15   :  { %379 = vmatpush3.bf16.msk.msra.mxu0 %vm338_vm11, %v439_v11  ;;  %v277_v39 = vrot.slane %v273_v34, %v276_v32  ;;  %v287_v41 = vrot.slane %v283_v36, %v276_v32 }
  0x16   :  { %380 = vmatprep.subr.msk.bf16.mxu0 %vm340_vm14, %v439_v11  ;;  %p422_p3 = por %p421_p2, %p420_p1 }
  0x17   :  { %vm278_vm11 = vcmp.eq.s32.totalorder %v277_v39, 1  ;;  %vm288_vm12 = vcmp.eq.s32.totalorder %v287_v41, 1 }
  0x18   :  { %p423_p4 = pnand %p422_p3, %p416_p0 }
  0x19   :  { %381 = vmatpush3.bf16.msk.msra.mxu0 %vm340_vm14, %v439_v11 }
  0x1a   :  { %382 = vmatprep.subr.msk.bf16.mxu0 %vm342_vm1, %v439_v11 }
  0x1d   :  { %383 = vmatpush3.bf16.msk.msra.mxu0 %vm342_vm1, %v439_v11 }
  0x1e   :  { %384 = vmatprep.subr.msk.bf16.mxu0 %vm344_vm4, %v439_v11 }
  0x21   :  { %385 = vmatpush3.bf16.msk.msra.mxu0 %vm344_vm4, %v439_v11 }
  0x22   :  { %386 = vmatprep.subr.msk.bf16.mxu0 %vm346_vm7, %v439_v11 }
  0x25   :  { %387 = vmatpush3.bf16.msk.msra.mxu0 %vm346_vm7, %v439_v11 }
  0x28   :  { %389 = vmatmul.mubr.bf16.vlgmr.msra.gmra.mrb[0].mxu0 %v410_v20 }
  0xfb   :  { %v390_v22 = vpop.f32.mrb[0].mxu0 }
  0xfc   :  { %v156_v23 = vpop.f32.mrb[1].mxu0 }
  0xfd   :  { %v391_v24 = vpop.f32.mrb[2].mxu0 }
  0xfe   :  { %v172_v25 = vpack.c.bf16 %v391_v24, %v390_v22  ;;  %v159_v26 = vpop.f32.mrb[3].mxu0 }
  0xff   :  { %v171_v27 = vpack.c.bf16 %v159_v26, %v156_v23 }
 0x101   :  { %392 = vmatprep.subr.bf16.mxu1 %v171_v27 }
 0x102   :  { %393 = vmatpush3.bf16.msra.mxu1 %v171_v27 }
 0x103   :  { %394 = vmatprep.subr.bf16.mxu1 %v172_v25 }
 0x106   :  { %395 = vmatpush3.bf16.msra.mxu1 %v172_v25 }
 0x109   :  { %397 = vmatmul.mubr.msk.bf16.vlgmr.msra.gmra.mrb[0].mxu1 %vm193_vm8, %v412_v28 }
 0x10a   :  { %400 = vmatprep.mubr.msk.bf16.mxu1 %vm193_vm8, %v413_v29 }
 0x111   :  { %401 = vmatmul.mubr.msk.bf16.gmra.mrb[4].mxu1 %vm193_vm8, %v414_v30 }
 0x1dc   :  { %v398_v35 = vpop.f32.mrb[0].mxu1 }
 0x1dd   :  { %v240_v37 = vpop.f32.mrb[1].mxu1 }
 0x1de   :  { %v399_v38 = vpop.f32.mrb[2].mxu1 }
 0x1df   :  { %v243_v40 = vpop.f32.mrb[3].mxu1 }
 0x1e4   :  { %v402_v42 = vpop.f32.mrb[4].mxu1 }
 0x1e5   :  { %v281_v43 = vsel %vm278_vm11, %v402_v42, 0.0  ;;  %v256_v44 = vpop.f32.mrb[5].mxu1 }
 0x1e6   :  { %v291_v45 = vsel %vm288_vm12, %v398_v35, %v281_v43  ;;  %v279_v46 = vsel %vm278_vm11, %v256_v44, 0.0  ;;  %v403_v47 = vpop.f32.mrb[6].mxu1 }
 0x1e7   :  { %295 = vst [vmem:[#allocation2 + $0x10] sm:$0xff] %v291_v45  ;;  %v289_v48 = vsel %vm288_vm12, %v240_v37, %v279_v46  ;;  %v282_v49 = vsel %vm278_vm11, %v403_v47, 0.0  ;;  %v259_v50 = vpop.f32.mrb[7].mxu1 }
 0x1e8   :  { %293 = vst [vmem:[#allocation2] sm:$0xff] %v289_v48  ;;  %v292_v51 = vsel %vm288_vm12, %v399_v38, %v282_v49  ;;  %v280_v52 = vsel %vm278_vm11, %v259_v50, 0.0 }
 0x1e9   :  { %296 = vst [vmem:[#allocation2 + $0x18] sm:$0xff] %v292_v51  ;;  %v290_v53 = vsel %vm288_vm12, %v243_v40, %v280_v52 }
 0x1ea   :  { %294 = vst [vmem:[#allocation2 + $0x8] sm:$0xff] %v290_v53 }
 0x1eb   :  { %426 = shalt.err (!%p423_p4)
}
 0x1ec   :  { %s427_s6 = scalar_lea.hbm %s540_s4, 512 }
 0x1ed   :  { %p428_p5 = scmp.ne.s32.totalorder %s540_s4, %s427_s6  ;;  %p431_p6 = scmp.lt.u32.totalorder %s427_s6, %s540_s4 }
 0x1ef   :  { %p433_p7 = pnand %p431_p6, %p428_p5 }
 0x1f1   :  { %436 = shalt.err (!%p433_p7)
}
 0x1f2   :  { %s442_s11 = smov 128   ;;  %s443_s12 = smov 8  }
 0x1f3   :  { %308 = dma.vmem_to_hbm [thread:$0]  %s303_s29, 512, %s540_s4, [#allocation3], %s442_s11, %s442_s11, %s443_s12  }
 0x1f4   :  { %437 = dma.done.wait [#allocation3], 512  }
 0x1f5   :  { %438 = vsyncadd [#allocation3], 4294966784 }
 0x1f6   :  { %312 = vsyncpa [#allocation3], 1 }

</bundles_post_ra>
